<compile_context>
chip_gen: v7x
topology: tpu7x:2x2x1
jax: 0.10.0
libtpu: 0.0.40
codegen_flags: <defaults>
</compile_context>

<pallas_src>
import functools
import math
import numpy as np
import jax
import jax.numpy as jnp
from jax import lax
from jax.experimental import pallas as pl
from jax.experimental.pallas import tpu as pltpu


_BALANCE = 5.0 / 45.0 - 0.1  # Taiji balance coefficient


# ----------------------------------------------------------------------------
# Lo Shu weight-template construction (deterministic glue, plain numpy / JAX)
# ----------------------------------------------------------------------------
def _lo_shu_enhanced():
    lo_shu = np.array([[4, 9, 2], [3, 5, 7], [8, 1, 6]], dtype=np.float32)
    normalized = 0.5 + 0.5 * (lo_shu - lo_shu.min()) / (lo_shu.max() - lo_shu.min())
    element_mapping = {1: 'water', 2: 'earth', 3: 'wood', 4: 'wood', 5: 'earth',
                       6: 'water', 7: 'metal', 8: 'metal', 9: 'fire'}
    element_strengths = {'water': 1.2, 'wood': 1.1, 'fire': 1.3, 'earth': 0.9, 'metal': 0.8}
    element_mask = np.ones_like(lo_shu)
    for i in range(3):
        for j in range(3):
            element_mask[i, j] = element_strengths[element_mapping[int(lo_shu[i, j])]]
    enhanced = normalized * element_mask
    enhanced = enhanced / enhanced.mean() * normalized.mean()
    return enhanced.astype(np.float32)


def _weight_template(in_features, out_features):
    enhanced = _lo_shu_enhanced()
    template = np.ones((out_features, in_features), dtype=np.float32)
    for i in range(0, out_features, 3):
        for j in range(0, in_features, 3):
            i_end = min(i + 3, out_features)
            j_end = min(j + 3, in_features)
            template[i:i_end, j:j_end] = enhanced[:i_end - i, :j_end - j]
    return template


def init_loshu_params(key, in_features, out_features, bias=True):
    """Deterministic parameter init mirroring LoShuLayer.reset_parameters."""
    k_w, k_b = jax.random.split(key)
    template = jnp.asarray(_weight_template(in_features, out_features))
    scale = math.sqrt(6.0 / (out_features + in_features))
    weight = template * jax.random.normal(k_w, (out_features, in_features), jnp.float32) * scale
    if bias:
        bound = 1.0 / math.sqrt(in_features)
        b = jax.random.uniform(k_b, (out_features,), jnp.float32, minval=0.0, maxval=bound)
    else:
        b = jnp.zeros((out_features,), jnp.float32)
    return weight, b


# ----------------------------------------------------------------------------
# Pallas kernel: fused linear + bias + Taiji balance (row-mean correction)
# ----------------------------------------------------------------------------
def _round_up(x, m):
    return ((x + m - 1) // m) * m


def _loshu_kernel(x_ref, w_ref, b_ref, o_ref, *, inv_out_f):
    # x_ref: (TM, in_f)        compute dtype (bf16)
    # w_ref: (out_fp, in_f)    compute dtype (bf16), VMEM-resident across steps
    # b_ref: (1, out_fp)       fp32 (padded entries are zero)
    # o_ref: (TM, out_fp)      fp32
    y = lax.dot_general(
        x_ref[...], w_ref[...],
        dimension_numbers=(((1,), (1,)), ((), ())),   # contract both on in_f
        preferred_element_type=jnp.float32)
    y = y + b_ref[...]
    # Padded output lanes have zero weight rows and zero bias, so the full-lane
    # sum equals the sum over the real out_features; divide by the true out_f.
    mean_act = jnp.sum(y, axis=1, keepdims=True) * inv_out_f
    o_ref[...] = y + _BALANCE * mean_act


def prepare_loshu_params(weight, bias, compute_dtype=jnp.bfloat16):
    """Pad out_features to a lane-dense multiple of 128 and cast once.

    In a real model call this once at init so no per-forward transpose/cast/pad
    traffic hits HBM.
    """
    out_f, in_f = weight.shape
    out_fp = _round_up(out_f, 128)
    w_p = jnp.pad(weight, ((0, out_fp - out_f), (0, 0))).astype(compute_dtype)
    b_p = jnp.pad(bias, (0, out_fp - out_f)).reshape(1, out_fp).astype(jnp.float32)
    return w_p, b_p, out_f


def loshu_forward(x, weight, bias, *, block_rows=512, compute_dtype=jnp.bfloat16):
    """x: (B, in_features); weight: (out_f, in_f); bias: (out_f,) -> (B, out_f) fp32."""
    B, in_f = x.shape
    w_c, b2, out_f = prepare_loshu_params(weight, bias, compute_dtype)
    out_fp = w_c.shape[0]

    # Batch tiling: rows padded to a sublane multiple of 8, tile of `block_rows`.
    b8 = _round_up(B, 8)
    tm = min(block_rows, b8)
    b_pad = _round_up(b8, tm)

    x_p = x if b_pad == B else jnp.pad(x, ((0, b_pad - B), (0, 0)))
    x_c = x_p.astype(compute_dtype)

    grid = (b_pad // tm,)

    itemsize = jnp.dtype(compute_dtype).itemsize
    vmem_bytes = (2 * tm * in_f * itemsize        # x tile (double-buffered)
                  + 2 * out_fp * in_f * itemsize  # resident weight
                  + 2 * out_fp * 4                # bias
                  + 2 * tm * out_fp * 4           # output tile (double-buffered)
                  + (2 << 20))                    # headroom
    vmem_bytes = int(max(4 << 20, min(vmem_bytes, 64 << 20)))

    out_p = pl.pallas_call(
        functools.partial(_loshu_kernel, inv_out_f=1.0 / out_f),
        out_shape=jax.ShapeDtypeStruct((b_pad, out_fp), jnp.float32),
        grid_spec=pltpu.PrefetchScalarGridSpec(
            num_scalar_prefetch=0,
            grid=grid,
            in_specs=[
                pl.BlockSpec((tm, in_f), lambda i: (i, 0)),        # x row-tile
                pl.BlockSpec((out_fp, in_f), lambda i: (0, 0)),    # weight: resident
                pl.BlockSpec((1, out_fp), lambda i: (0, 0)),       # bias: resident
            ],
            out_specs=pl.BlockSpec((tm, out_fp), lambda i: (i, 0)),
        ),
        compiler_params=pltpu.CompilerParams(
            dimension_semantics=("parallel",),
            vmem_limit_bytes=vmem_bytes,
        ),
    )(x_c, w_c, b2)

    return out_p[:B, :out_f]


# ----------------------------------------------------------------------------
# References (pure JAX) for sanity checking
# ----------------------------------------------------------------------------
def loshu_forward_ref_f32(x, weight, bias):
    y = x @ weight.T + bias
    m = jnp.mean(y, axis=1, keepdims=True)
    return y + _BALANCE * m


def loshu_forward_ref_bf16(x, weight, bias):
    y = jnp.dot(x.astype(jnp.bfloat16), weight.astype(jnp.bfloat16).T,
                preferred_element_type=jnp.float32) + bias
    m = jnp.mean(y, axis=1, keepdims=True)
    return y + _BALANCE * m


if __name__ == "__main__":
    key = jax.random.PRNGKey(0)
    k_param, k_x = jax.random.split(key)

    batch = 8
    in_features = 32
    out_features = 16

    weight, bias = init_loshu_params(k_param, in_features, out_features, bias=True)
    x = jax.random.normal(k_x, (batch, in_features), jnp.float32)

    out = jax.block_until_ready(loshu_forward(x, weight, bias))

    # Tight check vs a bf16-input / fp32-accumulation reference (same numerics).
    ref_bf16 = loshu_forward_ref_bf16(x, weight, bias)
    np.testing.assert_allclose(np.asarray(out), np.asarray(ref_bf16), rtol=2e-3, atol=2e-3)

    # Looser check vs the full-fp32 PyTorch-semantics reference.
    ref_f32 = loshu_forward_ref_f32(x, weight, bias)
    np.testing.assert_allclose(np.asarray(out), np.asarray(ref_f32), rtol=5e-2, atol=5e-2)

    print("KERNEL_OK")
</pallas_src>

<mosaic_0001>
module attributes {stable_mosaic.version = 11 : i64} {
  func.func @_loshu_kernel(%arg0: i32, %arg1: memref<8x32xbf16, #tpu.memory_space<vmem>>, %arg2: memref<128x32xbf16, #tpu.memory_space<vmem>>, %arg3: memref<1x128xf32, #tpu.memory_space<vmem>>, %arg4: memref<8x128xf32, #tpu.memory_space<vmem>>) attributes {dimension_semantics = [#tpu.dimension_semantics<parallel>], iteration_bounds = array<i64: 1>, scalar_prefetch = 0 : i64, scratch_operands = 0 : i64, tpu.core_type = #tpu.core_type<tc>, window_params = [{transform_indices = @transform_0, window_bounds = array<i64: 8, 32>}, {pipeline_mode = #tpu.pipeline_mode<synchronous>, transform_indices = @transform_1, window_bounds = array<i64: 128, 32>}, {pipeline_mode = #tpu.pipeline_mode<synchronous>, transform_indices = @transform_2, window_bounds = array<i64: 1, 128>}, {transform_indices = @transform_3, window_bounds = array<i64: 8, 128>}]} {
    %c0 = arith.constant 0 : index
    %c0_0 = arith.constant 0 : index
    %0 = vector.load %arg1[%c0, %c0_0] : memref<8x32xbf16, #tpu.memory_space<vmem>>, vector<8x32xbf16>
    %c0_1 = arith.constant 0 : index
    %c0_2 = arith.constant 0 : index
    %1 = vector.load %arg2[%c0_1, %c0_2] : memref<128x32xbf16, #tpu.memory_space<vmem>>, vector<128x32xbf16>
    %cst = arith.constant dense<0.000000e+00> : vector<8x128xf32>
    %2 = tpu.matmul %0, %1, %cst {dimension_numbers = #tpu.dot_dimension_numbers<[1], [1], [0], [0], [0, 0, 1, 0], [], []>} : vector<8x32xbf16>, vector<128x32xbf16>, vector<8x128xf32> -> vector<8x128xf32>
    %c0_3 = arith.constant 0 : index
    %c0_4 = arith.constant 0 : index
    %3 = vector.load %arg3[%c0_3, %c0_4] : memref<1x128xf32, #tpu.memory_space<vmem>>, vector<1x128xf32>
    %4 = vector.broadcast %3 : vector<1x128xf32> to vector<8x128xf32>
    %5 = arith.addf %2, %4 : vector<8x128xf32>
    %cst_5 = arith.constant dense<0.000000e+00> : vector<8xf32>
    %6 = vector.multi_reduction <add>, %5, %cst_5 [1] : vector<8x128xf32> to vector<8xf32>
    %7 = vector.shape_cast %6 : vector<8xf32> to vector<8x1xf32>
    %cst_6 = arith.constant 6.250000e-02 : f32
    %8 = vector.broadcast %cst_6 : f32 to vector<8x1xf32>
    %9 = arith.mulf %7, %8 : vector<8x1xf32>
    %cst_7 = arith.constant 0.0111111114 : f32
    %10 = vector.broadcast %cst_7 : f32 to vector<8x1xf32>
    %11 = arith.mulf %10, %9 : vector<8x1xf32>
    %12 = vector.broadcast %11 : vector<8x1xf32> to vector<8x128xf32>
    %13 = arith.addf %5, %12 : vector<8x128xf32>
    %c0_8 = arith.constant 0 : index
    %c0_9 = arith.constant 0 : index
    %14 = vector.load %arg4[%c0_8, %c0_9] : memref<8x128xf32, #tpu.memory_space<vmem>>, vector<8x128xf32>
    tpu.vector_store %arg4[%c0_8, %c0_9], %13 {strides = array<i32>} : memref<8x128xf32, #tpu.memory_space<vmem>>, vector<8x128xf32>,
    return
  }
  func.func @transform_0(%arg0: i32) -> (i32, i32) {
    %c0_i32 = arith.constant 0 : i32
    %c0_i32_0 = arith.constant 0 : i32
    return %arg0, %c0_i32 : i32, i32
  }
  func.func @transform_1(%arg0: i32) -> (i32, i32) {
    %c0_i32 = arith.constant 0 : i32
    %c0_i32_0 = arith.constant 0 : i32
    %c0_i32_1 = arith.constant 0 : i32
    return %c0_i32, %c0_i32_0 : i32, i32
  }
  func.func @transform_2(%arg0: i32) -> (i32, i32) {
    %c0_i32 = arith.constant 0 : i32
    %c0_i32_0 = arith.constant 0 : i32
    %c0_i32_1 = arith.constant 0 : i32
    return %c0_i32, %c0_i32_0 : i32, i32
  }
  func.func @transform_3(%arg0: i32) -> (i32, i32) {
    %c0_i32 = arith.constant 0 : i32
    %c0_i32_0 = arith.constant 0 : i32
    return %arg0, %c0_i32 : i32, i32
  }
}

</mosaic_0001>

<bundles_post_ra>
// kernel: tpu_custom_call.1
= control target key start
LH: loop header
LB: loop body
LE: loop exit
PB: predicated region body
PF: predicated region fallthrough
CT: control target
= control target key end

     0   :  { %v242_v1 = vmov 0.0   ;;  %vm80_vm0 = vcmask 261120   ;;  %vm243_vm1 = vmmov 0   ;;  %s316_s0 = inlined_call_operand.vmem [shape: bf16[8,32], index: 0, kind: input, shape index: {}]   ;;  %s317_s1 = inlined_call_operand.vmem [shape: bf16[128,32], index: 1, kind: input, shape index: {}]   ;;  %s318_s2 = inlined_call_operand.vmem [shape: f32[1,128], index: 2, kind: input, shape index: {}]   ;;  %s319_s3 = inlined_call_operand.hbm [shape: f32[8,128], index: 3, kind: output, shape index: {}]  }
   0x1   :  { %v210_v0 = vld [vmem:[%s317_s1] sm:$0xff]   ;;  %187 = vmatprep.subr.bf16.mxu0 %v242_v1  ;;  %v211_v3 = vld [vmem:[%s317_s1 + $0x8] sm:$0xff]   ;;  %203 = vmatprep.mubr.msk.bf16.mxu0 %vm243_vm1, %v242_v1 }
   0x2   :  { %v85_v2 = vsel %vm80_vm0, %v210_v0, 0  ;;  %v88_v4 = vsel %vm80_vm0, %v211_v3, 0 }
   0x3   :  { %188 = vmatpush3.bf16.xpose.msra.mxu0 %v85_v2 }
   0x4   :  { %189 = vmatprep.subr.bf16.mxu0 %v242_v1 }
   0x5   :  { %8 = vsyncpa [#allocation3], 0  ;;  %v212_v5 = vld [vmem:[%s317_s1 + $0x10] sm:$0xff]   ;;  %v213_v7 = vld [vmem:[%s317_s1 + $0x18] sm:$0xff]  }
   0x6   :  { %v91_v6 = vsel %vm80_vm0, %v212_v5, 0  ;;  %v94_v8 = vsel %vm80_vm0, %v213_v7, 0  ;;  %v214_v9 = vld [vmem:[%s317_s1 + $0x20] sm:$0xff]   ;;  %v215_v11 = vld [vmem:[%s317_s1 + $0x28] sm:$0xff]   ;;  %v216_v13 = vld [vmem:[%s317_s1 + $0x30] sm:$0xff]  }
   0x7   :  { %v97_v10 = vsel %vm80_vm0, %v214_v9, 0  ;;  %v100_v12 = vsel %vm80_vm0, %v215_v11, 0  ;;  %v103_v14 = vsel %vm80_vm0, %v216_v13, 0  ;;  %v217_v15 = vld [vmem:[%s317_s1 + $0x38] sm:$0xff]   ;;  %v16_v17 = vld [vmem:[%s316_s0] sm:$0xf] }
   0x8   :  { %v106_v16 = vsel %vm80_vm0, %v217_v15, 0  ;;  %v168_v18 = vld [vmem:[%s318_s2] ss:$0 sm:$0xff]  ;;  %s244_s1 = smov [#allocation2]  }
   0x9   :  { %s160_s5 = sshll.u32 %s244_s1, 4  ;;  %s161_s5 = int_to_ptr.vmem [resolvable:$true] %s160_s5 }
   0xa   :  { %s218_s0 = scalar_lea.vmem %s161_s5, 128  ;;  %p223_p1 = scmp.lt.s32.totalorder %s161_s5, %s161_s5 }
   0xb   :  { %190 = vmatpush3.bf16.xpose.msra.mxu0 %v88_v4  ;;  %p219_p0 = scmp.ne.s32.totalorder %s161_s5, %s218_s0  ;;  %p224_p2 = scmp.lt.s32.totalorder %s218_s0, %s218_s0 }
   0xc   :  { %191 = vmatprep.subr.bf16.mxu0 %v242_v1 }
   0xd   :  { %p225_p3 = por %p224_p2, %p223_p1 }
   0xf   :  { %p226_p4 = pnand %p225_p3, %p219_p0 }
  0x13   :  { %192 = vmatpush3.bf16.xpose.msra.mxu0 %v91_v6 }
  0x14   :  { %193 = vmatprep.subr.bf16.mxu0 %v242_v1 }
  0x1b   :  { %194 = vmatpush3.bf16.xpose.msra.mxu0 %v94_v8 }
  0x1c   :  { %195 = vmatprep.subr.bf16.mxu0 %v242_v1 }
  0x23   :  { %196 = vmatpush3.bf16.xpose.msra.mxu0 %v97_v10 }
  0x24   :  { %197 = vmatprep.subr.bf16.mxu0 %v242_v1 }
  0x2b   :  { %198 = vmatpush3.bf16.xpose.msra.mxu0 %v100_v12 }
  0x2c   :  { %199 = vmatprep.subr.bf16.mxu0 %v242_v1 }
  0x33   :  { %200 = vmatpush3.bf16.xpose.msra.mxu0 %v103_v14 }
  0x34   :  { %201 = vmatprep.subr.bf16.mxu0 %v242_v1 }
  0x3b   :  { %202 = vmatpush3.bf16.xpose.msra.mxu0 %v106_v16 }
  0x42   :  { %204 = vmatmul.mubr.msk.bf16.vlgmr.msra.gmra.mrb[0].mxu0 %vm80_vm0, %v16_v17 }
 0x115   :  { %v142_v19 = vpop.f32.mrb[0].mxu0 }
 0x116   :  { %v143_v20 = vadd.f32 %v168_v18, %v142_v19  ;;  %v205_v21 = vpop.f32.mrb[1].mxu0 }
 0x117   :  { %v145_v22 = vpop.f32.mrb[2].mxu0 }
 0x118   :  { %v206_v23 = vpop.f32.mrb[3].mxu0  ;;  %148 = vadd.xlane.f32.xlu0 %v143_v20 }
 0x1a5   :  { %v149_v24 = vpop.xlane.xlu0 %148 }
 0x1a6   :  { %v150_v25 = vmul.f32 0.0625, %v149_v24 }
 0x1a8   :  { %v151_v26 = vmul.f32 0.011111111, %v150_v25 }
 0x1aa   :  { %v152_v27 = vadd.f32 %v151_v26, %v143_v20 }
 0x1ac   :  { %153 = vst [vmem:[#allocation2] sm:$0xff] %v152_v27 }
 0x1ad   :  { %229 = shalt.err (!%p226_p4)
}
 0x1ae   :  { %s230_s7 = scalar_lea.hbm %s319_s3, 128 }
 0x1af   :  { %p231_p5 = scmp.ne.s32.totalorder %s319_s3, %s230_s7  ;;  %p234_p6 = scmp.lt.u32.totalorder %s230_s7, %s319_s3 }
 0x1b1   :  { %p236_p7 = pnand %p234_p6, %p231_p5 }
 0x1b3   :  { %239 = shalt.err (!%p236_p7)
}
 0x1b4   :  { %163 = dma.vmem_to_hbm [thread:$0]  %s161_s5, 128, %s319_s3, [#allocation3]  }
 0x1b5   :  { %240 = dma.done.wait [#allocation3], 128  }
 0x1b6   :  { %241 = vsyncadd [#allocation3], 4294967168 }
 0x1b7   :  { %167 = vsyncpa [#allocation3], 1 }

</bundles_post_ra>
